<compile_context>
chip_gen: v6e
topology: v6e:2x2x1
jax: 0.10.0
libtpu: 0.0.40
codegen_flags: <defaults>
</compile_context>

<pallas_src>
import functools

import jax
import jax.numpy as jnp
from jax.experimental import pallas as pl
from jax.experimental.pallas import tpu as pltpu

NUM_ANCHORS = 2
NUM_CLASSES = 2
BBOX_DIM = 4
LDM_DIM = 10

BBOX_OUT = NUM_ANCHORS * BBOX_DIM         # 8
CLS_OUT = NUM_ANCHORS * NUM_CLASSES       # 4
LDM_OUT = NUM_ANCHORS * LDM_DIM           # 20
TOTAL_OUT = BBOX_OUT + CLS_OUT + LDM_OUT  # 32
CLS_BASE = BBOX_OUT                       # row offset of the class logits


def _heads_kernel(x_ref, w_ref, b_ref, out_ref, *, apply_softmax,
                  compute_dtype):
    """Fused bbox/class/landmark 1x1-conv heads for one pixel-column tile.

    x_ref:   (1, C, BM)   feature pixels, channels-major (lanes = pixels)
    w_ref:   (32, C)      fused [bbox | cls | ldm] weights (grid-resident)
    b_ref:   (32, 1)      fused bias, f32 (grid-resident)
    out_ref: (1, 32, BM)  fused outputs, lane-dense on pixels
    """
    # In-kernel cast: the feature map is read from HBM exactly once (no
    # staging astype/pad/concat pass in the wrapper).
    x = x_ref[0].astype(compute_dtype)                      # (C, BM)
    w = w_ref[...]                                          # (32, C)
    # Single MXU matmul for all three heads; f32 accumulation + f32 bias.
    y = jnp.dot(w, x, preferred_element_type=jnp.float32) + b_ref[...]

    # Lane-dense, unmasked store of the fused slab.
    out_ref[0] = y.astype(out_ref.dtype)

    if apply_softmax:
        # Per-anchor 2-class softmax via the sigmoid identity:
        #   softmax([a, b]) = [1 - s, s],  s = 1 / (1 + exp(a - b)).
        # Exact reciprocal (still free: the kernel is HBM-BW bound) and only
        # the 4 class rows are overwritten -- no full-tile sublane concat.
        a0 = y[CLS_BASE + 0:CLS_BASE + 1]
        b0 = y[CLS_BASE + 1:CLS_BASE + 2]
        a1 = y[CLS_BASE + 2:CLS_BASE + 3]
        b1 = y[CLS_BASE + 3:CLS_BASE + 4]
        s0 = pl.reciprocal(1.0 + jnp.exp(a0 - b0), approx=False)
        s1 = pl.reciprocal(1.0 + jnp.exp(a1 - b1), approx=False)
        dt = out_ref.dtype
        out_ref[0, CLS_BASE + 0:CLS_BASE + 1, :] = (1.0 - s0).astype(dt)
        out_ref[0, CLS_BASE + 1:CLS_BASE + 2, :] = s0.astype(dt)
        out_ref[0, CLS_BASE + 2:CLS_BASE + 3, :] = (1.0 - s1).astype(dt)
        out_ref[0, CLS_BASE + 3:CLS_BASE + 4, :] = s1.astype(dt)


def retinaface_heads(features_nchw, params_per_scale, training=False, *,
                     tm=1024, compute_dtype=jnp.bfloat16,
                     out_dtype=jnp.bfloat16):
    """Replicates RetinaFace's head forward on the SSH feature maps.

    features_nchw: list of 3 arrays (N, C, H_i, W_i) (PyTorch NCHW layout),
        f32 or bf16 -- no wrapper-side cast/pad/concat is ever performed.
    params_per_scale: per level (wb(8,C), bb(8,1), wc(4,C), bc(4,1),
                                 wl(20,C), bl(20,1)) (= squeezed 1x1 convs).
    tm: pixel-column tile (multiple of 128). 512-1024 recommended on
        v6e/v7x at real RetinaFace resolutions; tiny levels automatically use
        a single full-width block instead.

    Returns (bbox, cls, ldm) in the PyTorch layout:
        bbox: (N, sum_i H_i*W_i*2, 4)
        cls : (N, sum_i H_i*W_i*2, 2)   (softmaxed over last dim in eval mode)
        ldm : (N, sum_i H_i*W_i*2, 10)
    """
    assert tm % 128 == 0, "pixel tile must be lane aligned (multiple of 128)"
    kernel = functools.partial(_heads_kernel, apply_softmax=not training,
                               compute_dtype=compute_dtype)
    out_itemsize = jnp.dtype(out_dtype).itemsize

    bbox_all, cls_all, ldm_all = [], [], []
    for x, (wb, bb, wc, bc, wl, bl) in zip(features_nchw, params_per_scale):
        n, c, h, w = x.shape
        hw = h * w
        # NCHW -> (N, C, H*W) is a pure metadata reshape (no HBM transpose,
        # no cast, no pad, no concat).
        xf = x.reshape(n, c, hw)
        # Fused per-level weights/bias (tiny: 32*C elements).
        w_f = jnp.concatenate([wb, wc, wl], axis=0).astype(compute_dtype)
        b_f = jnp.concatenate([bb, bc, bl], axis=0).astype(jnp.float32)

        # Tiny levels: one full-width block (no padding waste).  Big levels:
        # tm-wide tiles; a non-dividing edge tile is masked by Pallas.
        bm = hw if hw <= tm else tm
        n_col = pl.cdiv(hw, bm)

        flops = 2 * n * hw * c * TOTAL_OUT
        transcendentals = 0 if training else 2 * n * hw
        bytes_accessed = (xf.size * xf.dtype.itemsize
                          + n * TOTAL_OUT * hw * out_itemsize
                          + w_f.size * w_f.dtype.itemsize
                          + b_f.size * b_f.dtype.itemsize)

        out = pl.pallas_call(
            kernel,
            out_shape=jax.ShapeDtypeStruct((n, TOTAL_OUT, hw), out_dtype),
            grid=(n, n_col),
            in_specs=[
                # feature pixels for this (batch, column-tile)
                pl.BlockSpec((1, c, bm), lambda i, j: (i, 0, j)),
                # fused weights / bias: grid-resident (same block every step)
                pl.BlockSpec((TOTAL_OUT, c), lambda i, j: (0, 0)),
                pl.BlockSpec((TOTAL_OUT, 1), lambda i, j: (0, 0)),
            ],
            out_specs=pl.BlockSpec((1, TOTAL_OUT, bm), lambda i, j: (i, 0, j)),
            compiler_params=pltpu.CompilerParams(
                # every grid step is independent -> shard across TensorCores
                dimension_semantics=("parallel", "parallel")),
            cost_estimate=pl.CostEstimate(
                flops=flops, transcendentals=transcendentals,
                bytes_accessed=bytes_accessed),
        )(xf, w_f, b_f)

        # Small layout plumbing back to the PyTorch head layout (bf16 -> half
        # the bytes of the old f32 path; XLA fuses this with the final concat).
        out_t = jnp.transpose(out, (0, 2, 1))                 # (N, HW, 32)
        bbox_all.append(out_t[:, :, :BBOX_OUT]
                        .reshape(n, hw * NUM_ANCHORS, BBOX_DIM))
        cls_all.append(out_t[:, :, CLS_BASE:CLS_BASE + CLS_OUT]
                       .reshape(n, hw * NUM_ANCHORS, NUM_CLASSES))
        ldm_all.append(out_t[:, :, CLS_BASE + CLS_OUT:]
                       .reshape(n, hw * NUM_ANCHORS, LDM_DIM))

    bbox = jnp.concatenate(bbox_all, axis=1)
    cls = jnp.concatenate(cls_all, axis=1)
    ldm = jnp.concatenate(ldm_all, axis=1)
    return bbox, cls, ldm


def init_head_params(key, in_channels, fpn_num=3):
    """Deterministic synthetic init of the 1x1-conv head weights.

    PyTorch conv weight (out_ch, in_ch, 1, 1) is stored squeezed as
    (out_ch, in_ch); bias as (out_ch, 1).
    """
    params = []
    for _ in range(fpn_num):
        key, *ks = jax.random.split(key, 7)
        wb = 0.05 * jax.random.normal(ks[0], (BBOX_OUT, in_channels), jnp.float32)
        bb = 0.05 * jax.random.normal(ks[1], (BBOX_OUT, 1), jnp.float32)
        wc = 0.05 * jax.random.normal(ks[2], (CLS_OUT, in_channels), jnp.float32)
        bc = 0.05 * jax.random.normal(ks[3], (CLS_OUT, 1), jnp.float32)
        wl = 0.05 * jax.random.normal(ks[4], (LDM_OUT, in_channels), jnp.float32)
        bl = 0.05 * jax.random.normal(ks[5], (LDM_OUT, 1), jnp.float32)
        params.append((wb, bb, wc, bc, wl, bl))
    return params


def _reference_heads(features_nchw, params_per_scale, training=False):
    """Pure-JAX f32 reference mirroring the PyTorch semantics."""
    bbox_all, cls_all, ldm_all = [], [], []
    for x, (wb, bb, wc, bc, wl, bl) in zip(features_nchw, params_per_scale):
        N, C, H, W = x.shape
        xf = jnp.transpose(x, (0, 2, 3, 1)).reshape(N * H * W, C)
        bbox_all.append((xf @ wb.T + bb.T).reshape(N, H * W * NUM_ANCHORS, BBOX_DIM))
        cls_all.append((xf @ wc.T + bc.T).reshape(N, H * W * NUM_ANCHORS, NUM_CLASSES))
        ldm_all.append((xf @ wl.T + bl.T).reshape(N, H * W * NUM_ANCHORS, LDM_DIM))
    bbox = jnp.concatenate(bbox_all, axis=1)
    cls = jnp.concatenate(cls_all, axis=1)
    ldm = jnp.concatenate(ldm_all, axis=1)
    if not training:
        cls = jax.nn.softmax(cls, axis=-1)
    return bbox, cls, ldm


if __name__ == "__main__":
    key = jax.random.PRNGKey(0)
    k_feat, k_param = jax.random.split(key)

    N = 2
    out_channel = 64          # cfg['out_channel'] (small synthetic config)
    # Three SSH pyramid levels: 16x16 (two full 128-wide tiles), 14x14
    # (196 pixels -> exercises the masked edge tile), 4x4 (tiny full block).
    spatial = [16, 14, 4]

    feat_keys = jax.random.split(k_feat, 3)
    features = [
        jax.random.normal(fk, (N, out_channel, s, s), jnp.float32)
        for fk, s in zip(feat_keys, spatial)
    ]
    params = init_head_params(k_param, out_channel, fpn_num=3)

    # tm=128 for the tiny synthetic pyramid; use 512-1024 at real resolutions.
    bbox, cls, ldm = retinaface_heads(features, params, training=False, tm=128)
    jax.block_until_ready((bbox, cls, ldm))

    # Validate against the pure-JAX f32 reference (same semantics as the
    # PyTorch module in eval mode).  Tolerances relaxed for bf16 matmul inputs
    # and the bf16 output store.
    bbox_r, cls_r, ldm_r = _reference_heads(features, params, training=False)
    total_anchors = sum(s * s for s in spatial) * NUM_ANCHORS
    assert bbox.shape == (N, total_anchors, BBOX_DIM)
    assert cls.shape == (N, total_anchors, NUM_CLASSES)
    assert ldm.shape == (N, total_anchors, LDM_DIM)
    assert jnp.allclose(bbox.astype(jnp.float32), bbox_r, atol=3e-2, rtol=3e-2)
    assert jnp.allclose(cls.astype(jnp.float32), cls_r, atol=3e-2, rtol=3e-2)
    assert jnp.allclose(ldm.astype(jnp.float32), ldm_r, atol=3e-2, rtol=3e-2)

    print("KERNEL_OK")
</pallas_src>

<mosaic_0001>
module attributes {stable_mosaic.version = 11 : i64} {
  func.func @_heads_kernel(%arg0: i32, %arg1: i32, %arg2: memref<1x64x128xf32, #tpu.memory_space<vmem>>, %arg3: memref<32x64xbf16, #tpu.memory_space<vmem>>, %arg4: memref<32x1xf32, #tpu.memory_space<vmem>>, %arg5: memref<1x32x128xbf16, #tpu.memory_space<vmem>>) attributes {dimension_semantics = [#tpu.dimension_semantics<parallel>, #tpu.dimension_semantics<parallel>], iteration_bounds = array<i64: 2, 2>, scalar_prefetch = 0 : i64, scratch_operands = 0 : i64, tpu.core_type = #tpu.core_type<tc>, window_params = [{transform_indices = @transform_0, window_bounds = array<i64: 1, 64, 128>}, {pipeline_mode = #tpu.pipeline_mode<synchronous>, transform_indices = @transform_1, window_bounds = array<i64: 32, 64>}, {pipeline_mode = #tpu.pipeline_mode<synchronous>, transform_indices = @transform_2, window_bounds = array<i64: 32, 1>}, {transform_indices = @transform_3, window_bounds = array<i64: 1, 32, 128>}]} {
    %c0 = arith.constant 0 : index
    %c0_0 = arith.constant 0 : index
    %c0_1 = arith.constant 0 : index
    %0 = vector.load %arg2[%c0, %c0_0, %c0_1] : memref<1x64x128xf32, #tpu.memory_space<vmem>>, vector<1x64x128xf32>
    %1 = vector.shape_cast %0 : vector<1x64x128xf32> to vector<64x128xf32>
    %2 = arith.truncf %1 : vector<64x128xf32> to vector<64x128xbf16>
    %c0_2 = arith.constant 0 : index
    %c0_3 = arith.constant 0 : index
    %3 = vector.load %arg3[%c0_2, %c0_3] : memref<32x64xbf16, #tpu.memory_space<vmem>>, vector<32x64xbf16>
    %cst = arith.constant dense<0.000000e+00> : vector<32x128xf32>
    %4 = tpu.matmul %3, %2, %cst {dimension_numbers = #tpu.dot_dimension_numbers<[1], [0], [0], [1], [0, 0, 1, 1], [], []>} : vector<32x64xbf16>, vector<64x128xbf16>, vector<32x128xf32> -> vector<32x128xf32>
    %c0_4 = arith.constant 0 : index
    %c0_5 = arith.constant 0 : index
    %5 = vector.load %arg4[%c0_4, %c0_5] : memref<32x1xf32, #tpu.memory_space<vmem>>, vector<32x1xf32>
    %6 = vector.broadcast %5 : vector<32x1xf32> to vector<32x128xf32>
    %7 = arith.addf %4, %6 : vector<32x128xf32>
    %8 = arith.truncf %7 : vector<32x128xf32> to vector<32x128xbf16>
    %c0_6 = arith.constant 0 : index
    %c0_7 = arith.constant 0 : index
    %c0_8 = arith.constant 0 : index
    %9 = vector.load %arg5[%c0_6, %c0_7, %c0_8] : memref<1x32x128xbf16, #tpu.memory_space<vmem>>, vector<1x32x128xbf16>
    %10 = vector.shape_cast %9 : vector<1x32x128xbf16> to vector<32x128xbf16>
    %11 = vector.shape_cast %8 : vector<32x128xbf16> to vector<1x32x128xbf16>
    tpu.vector_store %arg5[%c0_6, %c0_7, %c0_8], %11 {strides = array<i32>} : memref<1x32x128xbf16, #tpu.memory_space<vmem>>, vector<1x32x128xbf16>,
    %12 = vector.extract_strided_slice %7 {offsets = [8, 0], sizes = [1, 128], strides = [1, 1]} : vector<32x128xf32> to vector<1x128xf32>
    %13 = vector.extract_strided_slice %7 {offsets = [9, 0], sizes = [1, 128], strides = [1, 1]} : vector<32x128xf32> to vector<1x128xf32>
    %14 = vector.extract_strided_slice %7 {offsets = [10, 0], sizes = [1, 128], strides = [1, 1]} : vector<32x128xf32> to vector<1x128xf32>
    %15 = vector.extract_strided_slice %7 {offsets = [11, 0], sizes = [1, 128], strides = [1, 1]} : vector<32x128xf32> to vector<1x128xf32>
    %16 = arith.subf %12, %13 : vector<1x128xf32>
    %17 = math.exp %16 : vector<1x128xf32>
    %cst_9 = arith.constant 1.000000e+00 : f32
    %18 = vector.broadcast %cst_9 : f32 to vector<1x128xf32>
    %19 = arith.addf %18, %17 : vector<1x128xf32>
    %20 = tpu.reciprocal %19 : vector<1x128xf32> -> vector<1x128xf32>
    %21 = arith.subf %14, %15 : vector<1x128xf32>
    %22 = math.exp %21 : vector<1x128xf32>
    %cst_10 = arith.constant 1.000000e+00 : f32
    %23 = vector.broadcast %cst_10 : f32 to vector<1x128xf32>
    %24 = arith.addf %23, %22 : vector<1x128xf32>
    %25 = tpu.reciprocal %24 : vector<1x128xf32> -> vector<1x128xf32>
    %cst_11 = arith.constant 1.000000e+00 : f32
    %26 = vector.broadcast %cst_11 : f32 to vector<1x128xf32>
    %27 = arith.subf %26, %20 : vector<1x128xf32>
    %28 = arith.truncf %27 : vector<1x128xf32> to vector<1x128xbf16>
    %c0_12 = arith.constant 0 : index
    %c8 = arith.constant 8 : index
    %c0_13 = arith.constant 0 : index
    %29 = vector.load %arg5[%c0_12, %c8, %c0_13] : memref<1x32x128xbf16, #tpu.memory_space<vmem>>, vector<1x1x128xbf16>
    %30 = vector.shape_cast %29 : vector<1x1x128xbf16> to vector<1x128xbf16>
    %31 = vector.shape_cast %28 : vector<1x128xbf16> to vector<1x1x128xbf16>
    tpu.vector_store %arg5[%c0_12, %c8, %c0_13], %31 {strides = array<i32>} : memref<1x32x128xbf16, #tpu.memory_space<vmem>>, vector<1x1x128xbf16>,
    %32 = arith.truncf %20 : vector<1x128xf32> to vector<1x128xbf16>
    %c0_14 = arith.constant 0 : index
    %c9 = arith.constant 9 : index
    %c0_15 = arith.constant 0 : index
    %33 = vector.load %arg5[%c0_14, %c9, %c0_15] : memref<1x32x128xbf16, #tpu.memory_space<vmem>>, vector<1x1x128xbf16>
    %34 = vector.shape_cast %33 : vector<1x1x128xbf16> to vector<1x128xbf16>
    %35 = vector.shape_cast %32 : vector<1x128xbf16> to vector<1x1x128xbf16>
    tpu.vector_store %arg5[%c0_14, %c9, %c0_15], %35 {strides = array<i32>} : memref<1x32x128xbf16, #tpu.memory_space<vmem>>, vector<1x1x128xbf16>,
    %cst_16 = arith.constant 1.000000e+00 : f32
    %36 = vector.broadcast %cst_16 : f32 to vector<1x128xf32>
    %37 = arith.subf %36, %25 : vector<1x128xf32>
    %38 = arith.truncf %37 : vector<1x128xf32> to vector<1x128xbf16>
    %c0_17 = arith.constant 0 : index
    %c10 = arith.constant 10 : index
    %c0_18 = arith.constant 0 : index
    %39 = vector.load %arg5[%c0_17, %c10, %c0_18] : memref<1x32x128xbf16, #tpu.memory_space<vmem>>, vector<1x1x128xbf16>
    %40 = vector.shape_cast %39 : vector<1x1x128xbf16> to vector<1x128xbf16>
    %41 = vector.shape_cast %38 : vector<1x128xbf16> to vector<1x1x128xbf16>
    tpu.vector_store %arg5[%c0_17, %c10, %c0_18], %41 {strides = array<i32>} : memref<1x32x128xbf16, #tpu.memory_space<vmem>>, vector<1x1x128xbf16>,
    %42 = arith.truncf %25 : vector<1x128xf32> to vector<1x128xbf16>
    %c0_19 = arith.constant 0 : index
    %c11 = arith.constant 11 : index
    %c0_20 = arith.constant 0 : index
    %43 = vector.load %arg5[%c0_19, %c11, %c0_20] : memref<1x32x128xbf16, #tpu.memory_space<vmem>>, vector<1x1x128xbf16>
    %44 = vector.shape_cast %43 : vector<1x1x128xbf16> to vector<1x128xbf16>
    %45 = vector.shape_cast %42 : vector<1x128xbf16> to vector<1x1x128xbf16>
    tpu.vector_store %arg5[%c0_19, %c11, %c0_20], %45 {strides = array<i32>} : memref<1x32x128xbf16, #tpu.memory_space<vmem>>, vector<1x1x128xbf16>,
    return
  }
  func.func @transform_0(%arg0: i32, %arg1: i32) -> (i32, i32, i32) {
    %c0_i32 = arith.constant 0 : i32
    %c0_i32_0 = arith.constant 0 : i32
    return %arg0, %c0_i32, %arg1 : i32, i32, i32
  }
  func.func @transform_1(%arg0: i32, %arg1: i32) -> (i32, i32) {
    %c0_i32 = arith.constant 0 : i32
    %c0_i32_0 = arith.constant 0 : i32
    %c0_i32_1 = arith.constant 0 : i32
    return %c0_i32, %c0_i32_0 : i32, i32
  }
  func.func @transform_2(%arg0: i32, %arg1: i32) -> (i32, i32) {
    %c0_i32 = arith.constant 0 : i32
    %c0_i32_0 = arith.constant 0 : i32
    %c0_i32_1 = arith.constant 0 : i32
    return %c0_i32, %c0_i32_0 : i32, i32
  }
  func.func @transform_3(%arg0: i32, %arg1: i32) -> (i32, i32, i32) {
    %c0_i32 = arith.constant 0 : i32
    %c0_i32_0 = arith.constant 0 : i32
    return %arg0, %c0_i32, %arg1 : i32, i32, i32
  }
}

</mosaic_0001>

<bundles_post_ra>
// kernel: tpu_custom_call.1
= control target key start
LH: loop header
LB: loop body
LE: loop exit
PB: predicated region body
PF: predicated region fallthrough
CT: control target
= control target key end

     0   :  { %8 = vsyncpa [#allocation3], 0  ;;  %s986_s0 = inlined_call_operand.hbm [shape: f32[2,64,256], index: 0, kind: input, shape index: {}]   ;;  %s987_s1 = inlined_call_operand.vmem [shape: bf16[32,64], index: 1, kind: input, shape index: {}]   ;;  %s988_s2 = inlined_call_operand.vmem [shape: f32[32,1], index: 2, kind: input, shape index: {}]   ;;  %s989_s3 = inlined_call_operand.hbm [shape: bf16[2,32,256], index: 3, kind: output, shape index: {}]  }
   0x1   :  { %10 = vsyncpa [#allocation3 + $0x1], 0 }
   0x2   :  { %11 = vsyncpa [#allocation4], 0 }
   0x3   :  { %13 = vsyncpa [#allocation4 + $0x1], 0  ;;  %s782_s12 = smov 0   ;;  %s784_s13 = smov 0  }
   0x4   :  { %s786_s14 = smov 0   ;;  %s788_s15 = smov 0  }
   0x5   :  { %s790_s16 = smov 0   ;;  %s792_s17 = smov 0  }
   0x6   :  { %s794_s18 = smov 0   ;;  %s796_s19 = smov 0  }
   0x7 LB: > { %s476_s20 = sadd.s32 4294967295, %s751_s19   ;;  %s477_s21 = sadd.s32 4294967294, %s751_s19   ;;  %s751_s19 = sphi %s796_s19, %s19_s19   ;;  %s747_s18 = sphi %s794_s18, %s1007_s18   ;;  %s743_s17 = sphi %s792_s17, %s1006_s17   ;;  %s739_s16 = sphi %s790_s16, %s1005_s16   ;;  %s735_s15 = sphi %s788_s15, %s1004_s15   ;;  %s731_s14 = sphi %s786_s14, %s1003_s14   ;;  %s727_s13 = sphi %s784_s13, %s1002_s13   ;;  %s723_s12 = sphi %s782_s12, %s1001_s12  }
   0x8   : > { %s28_s22 = sadd.s32 1, %s743_s17  ;;  %s31_s23 = sadd.s32 1, %s747_s18 }
   0x9   : > { %p29_p0 = scmp.ge.s32.totalorder %s28_s22, 2  ;;  %s40_s24 = sadd.s32 1, %s731_s14 }
   0xa   : > { %p47_p1 = scmp.ne.s32.totalorder %s731_s14, %s727_s13  ;;  %p48_p2 = scmp.eq.s32.totalorder %s751_s19, 0 }
   0xb   : > { %s1009_s22 = smov (%p29_p0, %s28_s22), 0  ;;  %s1011_s23 = smov (!%p29_p0, %s31_s23), %s747_s18 }
   0xc   : > { %992 = sst [smem:[#allocation8_spill]] %s1009_s22  ;;  %s36_s25 = ssub.s32 %s743_s17, %s1009_s22 }
   0xd   : > { %p835_p3 = por %p48_p2, %p47_p1  ;;  %p33_p4 = scmp.ge.s32.totalorder %s1011_s23, 2 }
   0xe   : > { %p53_p5 = scmp.ne.s32.totalorder %s727_s13, %s723_s12  ;;  %p54_p6 = scmp.eq.s32.totalorder %s476_s20, 0 }
   0xf   : > { %p121_p7 = scmp.eq.s32.totalorder %s476_s20, 3  ;;  %s1013_s23 = smov (%p33_p4, %s1011_s23), 0 }
  0x10   : > { %994 = sst [smem:[#allocation9_spill]] %s1013_s23  ;;  %p843_p8 = por %p54_p6, %p53_p5 }
  0x11   : > { %p847_p9 = por %p121_p7, %p47_p1  ;;  %s35_s29 = ssub.s32 %s747_s18, %s1013_s23 }
  0x12   : > { %p127_p10 = scmp.eq.s32.totalorder %s477_s21, 3  ;;  %s37_s30 = sor.u32 %s36_s25, %s35_s29 }
  0x13   : > { %p38_p11 = scmp.eq.s32.totalorder %s37_s30, 0  ;;  %p546_p13 = scmp.lt.s32.totalorder %s751_s19, 4 }
  0x14   : > { %p853_p12 = por %p127_p10, %p53_p5  ;;  %s153_s5 = sand.u32 1, %s731_s14  }
  0x15   : > { %s860_s6 = scalar_select %p38_p11, %s731_s14, %s40_s24  }
  0x16   : > { %s480_s7 = sshll.u32 %s153_s5, 6  ;;  %s481_s8 = sshll.u32 %s747_s18, 4 }
  0x17   : > { %s162_s9 = sadd.s32 %s743_s17, %s481_s8  ;;  %s157_s10 = scalar_lea.vmem [#allocation2], %s480_s7 }
  0x18   : > { %s165_s11 = sshll.u32 %s157_s10, 4  ;;  %s482_s20 = sshll.u32 %s162_s9, 7  ;;  %s166_s11 = int_to_ptr.vmem [resolvable:$true] %s165_s11 }
  0x19   : > { %s164_s21 = scalar_lea.hbm %s986_s0, %s482_s20  ;;  %p869_p0 = pnand %p546_p13, %p835_p3 }
  0x1a   : > { %s154_s29 = scalar_lea.sflag [#allocation3], %s153_s5  ;;  %s640_s24 = scalar_lea.vmem %s166_s11, 1024 }
  0x1b   : > { %p629_p1 = pneg %p869_p0  ;;  %p641_p2 = scmp.ne.s32.totalorder %s166_s11, %s640_s24 }
  0x1c   : > { %s753_s30 = smov [#allocation2]  }
  0x1d   : > { %p643_p4 = pnand %p641_p2, %p629_p1  ;;  %s645_s7 = sshll.u32 %s753_s30, 4  ;;  %s646_s7 = int_to_ptr.vmem [resolvable:$false] %s645_s7 }
  0x1e   : > { %s647_s8 = scalar_lea.vmem %s646_s7, 2048  ;;  %p648_p6 = scmp.lt.s32.totalorder %s166_s11, %s646_s7 }
  0x1f   : > { %p644_p5 = pneg %p643_p4  ;;  %p649_p7 = scmp.lt.s32.totalorder %s647_s8, %s640_s24 }
  0x21   : > { %p650_p10 = por %p649_p7, %p648_p6 }
  0x23   : > { %p651_p11 = pnand %p650_p10, %p644_p5 }
  0x25   : > { %654 = shalt.err (!%p651_p11)
}
  0x26   : > { %s754_s22 = smov 256   ;;  %s755_s23 = smov 128  }
  0x27   : > { %s756_s26 = smov 8   ;;  %p483_p3 = scmp.ge.s32.totalorder %s751_s19, 1 }
  0x28   : > { %541 = dma.hbm_to_vmem [thread:$0]  (!%p869_p0), %s164_s21, 1024, %s166_s11, %s154_s29, %s754_s22, %s755_s23, %s756_s26  }
  0x29   : > { %p173_p13 = scmp.lt.s32.totalorder %s751_s19, 5 }
  0x2b   : > { %p174_p1 = pnand %p483_p3, %p173_p13 }
  0x2c   : > { %s880_s5 = sand.u32 (!%p174_p1), 1, %s727_s13  }
  0x2d   : > { %177 = sbr.rel (%p174_p1) target bundleno = 336 (0x150), region = 32  ;;  %s484_s9 = sshll.u32 (!%p174_p1), %s880_s5, 6 }
  0x2e   : > { %s180_s10 = scalar_lea.sflag (!%p174_p1), [#allocation3], %s880_s5  ;;  %s183_s20 = scalar_lea.vmem (!%p174_p1), [#allocation2], %s484_s9 }
  0x32   : > { %714 = dma.done.wait (%p843_p8), %s180_s10, 1024  }
  0x33   : > { %716 = vsyncadd (%p843_p8), %s180_s10, 4294966272  ;;  %v757_v0 = vmov 0   ;;  %v213_v1 = vld [vmem:[%s183_s20 + $0x30] sm:$0xff]  ;;  %v214_v2 = vld [vmem:[%s183_s20 + $0x38] sm:$0xff]  ;;  %vm257_vm0 = vcmask 523264   ;;  %s485_s9 = sshll.u32 %s880_s5, 4 }
  0x34   : > { %619 = vset.pattern.permute.xlu0 %v757_v0  ;;  %620 = vset.pattern.permute.xlu1 %v757_v0  ;;  %v211_v3 = vld [vmem:[%s183_s20 + $0x20] sm:$0xff]  ;;  %v218_v4 = vpack.c.bf16 %v214_v2, %v213_v1  ;;  %v212_v5 = vld [vmem:[%s183_s20 + $0x28] sm:$0xff]  ;;  %v209_v7 = vld [vmem:[%s183_s20 + $0x10] sm:$0xff]  ;;  %s909_s10 = scalar_lea.vmem [#allocation5], %s485_s9  ;;  %vm343_vm1 = vcmask 1040384   ;;  %vm362_vm3 = vcmask 1041409  }
  0x35   : > { %v217_v6 = vpack.c.bf16 %v212_v5, %v211_v3  ;;  %v210_v8 = vld [vmem:[%s183_s20 + $0x18] sm:$0xff]  ;;  %v621_v9 = vld [vmem:[%s987_s1] sm:$0xff]   ;;  %v224_v10 = vld [vmem:[%s988_s2 + $0x8] sm:$0xff]  ;;  %vm344_vm2 = vsmask.f32 256  ;;  %s388_s27 = sshll.u32 %s909_s10, 4  ;;  %s929_s27 = int_to_ptr.vmem [resolvable:$true] %s388_s27 }
  0x36   : > { %522 = vmatprep.subr.bf16.mxu0 %v218_v4  ;;  %v216_v11 = vpack.c.bf16 %v210_v8, %v209_v7  ;;  %530 = vmatprep.mubr.msk.bf16.mxu0 %vm257_vm0, %v621_v9  ;;  %v225_v12 = vld [vmem:[%s988_s2 + $0x10] sm:$0xff]  ;;  %v207_v13 = vld [vmem:[%s183_s20] sm:$0xff]  ;;  %v208_v14 = vld [vmem:[%s183_s20 + $0x8] sm:$0xff]  ;;  %vm363_vm4 = vsmask.f32 1280  ;;  %s496_s20 = sshll.u32 %s739_s16, 3 }
  0x37   : > { %523 = vmatpush3.bf16.msra.mxu0 %v218_v4  ;;  %234 = vperm.xlu0 %619, %v224_v10   ;;  %v223_v15 = vld [vmem:[%s988_s2] sm:$0xff]  ;;  %v226_v16 = vld [vmem:[%s988_s2 + $0x18] sm:$0xff]  ;;  %v215_v17 = vpack.c.bf16 %v208_v14, %v207_v13  ;;  %v622_v18 = vld [vmem:[%s987_s1 + $0x8] sm:$0xff]   ;;  %s385_s11 = sadd.s32 %s735_s15, %s496_s20  ;;  %vm357_vm7 = vsmask.f32 7938  ;;  %s374_s15 = scalar_lea.sflag [#allocation4], %s880_s5 }
  0x38   : > { %524 = vmatprep.subr.bf16.mxu0 %v217_v6  ;;  %239 = vperm.xlu1 %620, %v225_v12   ;;  %vm345_vm5 = vmand %vm343_vm1, %vm344_vm2  ;;  %vm368_vm8 = vsmask.f32 7942  ;;  %s497_s21 = sshll.u32 %s385_s11, 6  ;;  %s655_s24 = scalar_lea.vmem %s929_s27, 256 }
  0x39   : > { %vm364_vm6 = vmand %vm362_vm3, %vm363_vm4  ;;  %s927_s29 = scalar_lea.hbm %s989_s3, %s497_s21  ;;  %p656_p8 = scmp.ne.s32.totalorder %s929_s27, %s655_s24 }
  0x3a   : > { %vm358_vm9 = vmand %vm343_vm1, %vm357_vm7  ;;  %s758_s30 = smov [#allocation5]  }
  0x3b   : > { %525 = vmatpush3.bf16.msra.mxu0 %v217_v6  ;;  %229 = vperm.xlu0 %619, %v223_v15   ;;  %vm369_vm10 = vmand %vm362_vm3, %vm368_vm8  ;;  %p657_p0 = pnand %p656_p8, %p847_p9  ;;  %s659_s7 = sshll.u32 %s758_s30, 4  ;;  %s660_s7 = int_to_ptr.vmem [resolvable:$false] %s659_s7 }
  0x3c   : > { %526 = vmatprep.subr.bf16.mxu0 %v216_v11  ;;  %244 = vperm.xlu1 %620, %v226_v16   ;;  %s661_s8 = scalar_lea.vmem %s660_s7, 512  ;;  %p662_p4 = scmp.lt.s32.totalorder %s929_s27, %s660_s7 }
  0x3d   : > { %p658_p2 = pneg %p657_p0  ;;  %p663_p5 = scmp.lt.s32.totalorder %s661_s8, %s655_s24 }
  0x3f   : > { %527 = vmatpush3.bf16.msra.mxu0 %v216_v11  ;;  %p664_p6 = por %p663_p5, %p662_p4 }
  0x40   : > { %528 = vmatprep.subr.bf16.mxu0 %v215_v17 }
  0x41   : > { %p665_p7 = pnand %p664_p6, %p658_p2 }
  0x43   : > { %529 = vmatpush3.bf16.msra.mxu0 %v215_v17 }
  0x46   : > { %531 = vmatmul.mubr.msk.bf16.vlgmr.msra.gmra.mxu0 %vm257_vm0, %v622_v18 }
  0xb2   : > { %v235_v20 = vpop.permute.xlu0 %234 }
  0xb3   : > { %v240_v19 = vpop.permute.xlu1 %239 }
  0xb6   : > { %v230_v24 = vpop.permute.xlu0 %229 }
  0xb7   : > { %v245_v23 = vpop.permute.xlu1 %244 }
 0x106   : > { %v532_v21 = vpop.f32.mrf.mxu0 }
 0x107   : > { %v307_v26 = vadd.f32 %v532_v21, %v240_v19 }
 0x108   : > { %v298_v22 = vpop.f32.mrf.mxu0 }
 0x109   : > { %v299_v29 = vadd.f32 %v298_v22, %v230_v24 }
 0x10a   : > { %v533_v25 = vpop.f32.mrf.mxu0 }
 0x10b   : > { %v310_v27 = vadd.f32 %v533_v25, %v245_v23 }
 0x10c   : > { %v301_v28 = vpop.f32.mrf.mxu0 }
 0x10d   : > { %v513_v30 = vpack.c.bf16 %v310_v27, %v307_v26  ;;  %v302_v31 = vadd.f32 %v301_v28, %v235_v20 }
 0x10f   : > { %515 = vst [vmem:[%s909_s10 + $0x8] sm:$0xff] %v513_v30   ;;  %v508_v32 = vpack.c.bf16 %v302_v31, %v299_v29  ;;  %v334_v33 = vrot.slane %v302_v31, 1 }
 0x111   : > { %509 = vst [vmem:[%s909_s10] sm:$0xff] %v508_v32   ;;  %v336_v34 = vsub.f32 %v302_v31, %v334_v33 }
 0x113   : > { %v337_v35 = vmul.f32 1.442695, %v336_v34 }
 0x115   : > { %623 = vpow2.f32 %v337_v35 }
 0x118   : > { %v346_v41 = vld [vmem:[%s909_s10 + $0x4] sm:$0x1]  ;;  %v365_v42 = vld [vmem:[%s909_s10 + $0x4] sm:$0x2] }
 0x122   : > { %v624_v36 = vpop.eup %623 }
 0x123   : > { %v339_v37 = vadd.f32 1.0, %v624_v36 }
 0x125   : > { %625 = vrcp.f32 %v339_v37 }
 0x132   : > { %v626_v38 = vpop.eup %625 }
 0x133   : > { %v341_v39 = vsub.f32 1.0, %v626_v38  ;;  %v504_v45 = vpack.c.bf16 %v626_v38, %v626_v38 }
 0x135   : > { %v342_v40 = vpack.c.bf16 %v341_v39, %v341_v39  ;;  %v354_v46 = vshll.u32 %v504_v45, 16 }
 0x137   : > { %v347_v43 = vsel %vm345_vm5, %v342_v40, %v346_v41  ;;  %v366_v44 = vsel %vm364_vm6, %v342_v40, %v365_v42 }
 0x138   : > { %348 = vst [vmem:[%s909_s10 + $0x4] sm:$0x1] %v347_v43  ;;  %367 = vst [vmem:[%s909_s10 + $0x4] sm:$0x2] %v366_v44 }
 0x13f   : > { %v359_v47 = vld [vmem:[%s909_s10 + $0x4] sm:$0x1]  ;;  %v370_v48 = vld [vmem:[%s909_s10 + $0x4] sm:$0x2] }
 0x140   : > { %v360_v49 = vsel %vm358_vm9, %v354_v46, %v359_v47  ;;  %v371_v50 = vsel %vm369_vm10, %v354_v46, %v370_v48 }
 0x141   : > { %361 = vst [vmem:[%s909_s10 + $0x4] sm:$0x1] %v360_v49  ;;  %372 = vst [vmem:[%s909_s10 + $0x4] sm:$0x2] %v371_v50 }
 0x142   : > { %668 = shalt.err (!%p665_p7)
}
 0x143   : > { %s669_s22 = scalar_lea.hbm %s927_s29, 256  ;;  %s673_s9 = scalar_lea.hbm %s989_s3, 1024 }
 0x144   : > { %p670_p10 = scmp.ne.s32.totalorder %s927_s29, %s669_s22  ;;  %p674_p13 = scmp.lt.s32.totalorder %s927_s29, %s989_s3 }
 0x145   : > { %p675_p1 = scmp.lt.s32.totalorder %s673_s9, %s669_s22 }
 0x146   : > { %p671_p11 = pnand %p670_p10, %p847_p9 }
 0x147   : > { %p676_p8 = por %p675_p1, %p674_p13 }
 0x148   : > { %p672_p3 = pneg %p671_p11 }
 0x14a   : > { %p677_p0 = pnand %p676_p8, %p672_p3 }
 0x14c   : > { %680 = shalt.err (!%p677_p0)
}
 0x14d   : > { %s759_s11 = smov 64   ;;  %s760_s21 = smov 128  }
 0x14e   : > { %s761_s16 = smov 4  }
 0x14f   : > { %536 = dma.vmem_to_hbm [thread:$0]  (%p847_p9), %s929_s27, 256, %s927_s29, %s374_s15, %s759_s11, %s760_s21, %s761_s16  }
 0x150 PF: > { %p547_p2 = scmp.ge.s32.totalorder %s751_s19, 2  ;;  %s403_s25 = sand.u32 1, %s723_s12  }
 0x151   : > { %s404_s24 = scalar_lea.sflag [#allocation4], %s403_s25 }
 0x152   : > { %p543_p4 = pnand %p547_p2, %p853_p12 }
 0x154   : > { %p544_p5 = pneg %p543_p4 }
 0x156   : > { %718 = dma.done.wait (%p544_p5), %s404_s24, 256  }
 0x157   : > { %720 = vsyncadd (%p544_p5), %s404_s24, 4294967040  ;;  %s19_s19 = sadd.s32 1, %s751_s19   ;;  %s999_s28 = sld [smem:[#allocation8_spill]] }
 0x158   : > { %p16_p6 = scmp.ge.s32.totalorder %s19_s19, 6   ;;  %s1000_s5 = sld [smem:[#allocation9_spill]] }
 0x159   : > { %s1001_s12 = smov %s727_s13  ;;  %s1002_s13 = smov %s731_s14 }
 0x15a   : > { %s1003_s14 = smov %s860_s6  ;;  %s1004_s15 = smov %s743_s17 }
 0x15b   : > { %s1005_s16 = smov %s747_s18  ;;  %18 = sbr.rel (!%p16_p6) target bundleno = 7 (0x7), region = 77 }
 0x15d   : > { %s1006_s17 = smov %s999_s28 }
 0x15e   : > { %s1007_s18 = smov %s1000_s5 }
 0x160   :  { %409 = vsyncpa [#allocation3], 1 }
 0x161   :  { %411 = vsyncpa [#allocation3 + $0x1], 1 }
 0x162   :  { %412 = vsyncpa [#allocation4], 1 }
 0x163   :  { %414 = vsyncpa [#allocation4 + $0x1], 1 }

</bundles_post_ra>
